<compile_context>
chip_gen: v6e
topology: v6e:2x2x1
jax: 0.10.0
libtpu: 0.0.40
codegen_flags: <defaults>
</compile_context>

<pallas_src>
import functools

import jax
import jax.numpy as jnp
from jax.experimental import pallas as pl
from jax.experimental.pallas import tpu as pltpu


def _ls_ce_kernel(x_ref, tgt_ref, out_ref, *, smoothing, tile_rows, total_rows):
    i = pl.program_id(0)
    confidence = 1.0 - smoothing

    x = x_ref[...].astype(jnp.float32)                         # (T, C)
    n_cls = x.shape[-1]

    m = jnp.max(x, axis=-1, keepdims=True)                     # (T, 1)
    shifted = x - m                                            # (T, C)
    lse = jnp.log(jnp.sum(jnp.exp(shifted), axis=-1, keepdims=True))  # (T, 1)

    # smooth_loss = -mean(log_softmax, -1) = lse - mean(shifted, -1)
    row_sum = jnp.sum(shifted, axis=-1, keepdims=True)         # (T, 1)
    smooth_loss = lse - row_sum * (1.0 / n_cls)                # (T, 1)

    # nll_loss = -log_softmax[row, target] = lse - shifted[row, target]
    # (one-hot gather via lane iota; no materialized logprobs tensor)
    tgt = tgt_ref[...]                                         # (T, 1) int32
    col = jax.lax.broadcasted_iota(jnp.int32, shifted.shape, 1)
    tgt_val = jnp.sum(jnp.where(col == tgt, shifted, 0.0),
                      axis=-1, keepdims=True)                  # (T, 1)
    nll_loss = lse - tgt_val                                   # (T, 1)

    loss = confidence * nll_loss + smoothing * smooth_loss     # (T, 1)

    # Mask out padded rows (global row index >= total_rows).
    row = jax.lax.broadcasted_iota(jnp.int32, loss.shape, 0) + i * tile_rows
    loss = jnp.where(row < total_rows, loss, 0.0)

    tile_sum = jnp.sum(loss)                                   # scalar f32
    out_ref[...] = jnp.broadcast_to(tile_sum, out_ref.shape).astype(jnp.float32)


def _choose_tile_rows(n_rows, n_cls, x_itemsize,
                      vmem_budget_bytes=24 * 1024 * 1024):
    # Bytes resident in VMEM per tile row: double-buffered input block plus
    # roughly three (T, C) f32 temporaries inside the kernel, plus (T, 1) bits.
    per_row = n_cls * (2 * x_itemsize + 3 * 4) + 64
    tr = vmem_budget_bytes // per_row
    tr = max(8, min(int(tr), 2048))
    tr = (tr // 8) * 8
    # No point tiling wider than the (padded-up) row count.
    tr = min(tr, max(8, ((n_rows + 7) // 8) * 8))
    return int(tr)


def label_smoothing_cross_entropy(x, target, smoothing=0.1, tile_rows=None):
    """x: (N, C) float logits (f32 or bf16); target: (N,) int class indices.

    Returns the scalar label-smoothed cross-entropy (mean over rows).
    """
    assert smoothing < 1.0
    N, C = x.shape
    itemsize = jnp.dtype(x.dtype).itemsize
    if tile_rows is None:
        tile_rows = _choose_tile_rows(N, C, itemsize)

    n_tiles = -(-N // tile_rows)            # cdiv
    n_pad = n_tiles * tile_rows

    tgt2d = target.astype(jnp.int32).reshape(N, 1)
    if n_pad != N:
        x = jnp.pad(x, ((0, n_pad - N), (0, 0)))
        tgt2d = jnp.pad(tgt2d, ((0, n_pad - N), (0, 0)))

    kernel = functools.partial(
        _ls_ce_kernel,
        smoothing=float(smoothing),
        tile_rows=tile_rows,
        total_rows=N,
    )

    # Scoped-VMEM limit: double-buffered x block + f32 temporaries + slack.
    # Kept <= 64 MiB so it is valid on v7x as well as v5e/v6e.
    vmem_limit = int(min(
        64 * 1024 * 1024,
        max(32 * 1024 * 1024,
            tile_rows * C * (2 * itemsize + 3 * 4) + (4 << 20)),
    ))

    partials = pl.pallas_call(
        kernel,
        out_shape=jax.ShapeDtypeStruct((n_tiles, 1, 128), jnp.float32),
        grid_spec=pltpu.PrefetchScalarGridSpec(
            num_scalar_prefetch=0,
            grid=(n_tiles,),
            in_specs=[
                pl.BlockSpec((tile_rows, C), lambda i: (i, 0)),
                pl.BlockSpec((tile_rows, 1), lambda i: (i, 0)),
            ],
            out_specs=pl.BlockSpec((1, 1, 128), lambda i: (i, 0, 0)),
        ),
        compiler_params=pltpu.CompilerParams(
            dimension_semantics=("parallel",),   # independent tiles -> v7x megacore
            vmem_limit_bytes=vmem_limit,
        ),
    )(x, tgt2d)

    # Final reduction over per-tile partial sums in the wrapper.
    return jnp.sum(partials[:, 0, 0]) / jnp.float32(N)


def _reference(x, target, smoothing=0.1):
    # Pure-JAX reference mirroring the PyTorch module (hard-label branch).
    logprobs = jax.nn.log_softmax(x.astype(jnp.float32), axis=-1)
    smooth_loss = -jnp.mean(logprobs, axis=-1)
    nll_loss = -jnp.take_along_axis(logprobs, target[:, None], axis=-1)[:, 0]
    loss = (1.0 - smoothing) * nll_loss + smoothing * smooth_loss
    return jnp.mean(loss)


if __name__ == "__main__":
    key = jax.random.PRNGKey(0)
    kx1, kt1, kx2, kt2 = jax.random.split(key, 4)

    # Case 1: small shapes, rows divide the tile evenly.
    N1, C1 = 16, 32
    x1 = jax.random.normal(kx1, (N1, C1), dtype=jnp.float32)
    t1 = jax.random.randint(kt1, (N1,), 0, C1, dtype=jnp.int32)
    loss1 = jax.block_until_ready(label_smoothing_cross_entropy(x1, t1, smoothing=0.1))
    ref1 = _reference(x1, t1, smoothing=0.1)
    assert jnp.allclose(loss1, ref1, atol=1e-5, rtol=1e-5), (loss1, ref1)

    # Case 2: N not a multiple of the chosen tile -> exercises padding + mask.
    N2, C2 = 20, 32
    x2 = jax.random.normal(kx2, (N2, C2), dtype=jnp.float32)
    t2 = jax.random.randint(kt2, (N2,), 0, C2, dtype=jnp.int32)
    loss2 = jax.block_until_ready(label_smoothing_cross_entropy(x2, t2, smoothing=0.1))
    ref2 = _reference(x2, t2, smoothing=0.1)
    assert jnp.allclose(loss2, ref2, atol=1e-5, rtol=1e-5), (loss2, ref2)

    # TODO(synk): soft-label branch (target.dim()==2) not implemented; it would
    # reuse the same kernel with -sum(target * logprobs) instead of the one-hot
    # gather.  Tiny-C inputs (C < 128, like this demo) use only C of 128 lanes;
    # packing multiple samples per vreg row would recover lane utilization.

    print("KERNEL_OK")
</pallas_src>

<mosaic_0001>
module attributes {stable_mosaic.version = 11 : i64} {
  func.func @_ls_ce_kernel(%arg0: i32, %arg1: memref<16x32xf32, #tpu.memory_space<vmem>>, %arg2: memref<16x1xi32, #tpu.memory_space<vmem>>, %arg3: memref<1x1x128xf32, #tpu.memory_space<vmem>>) attributes {dimension_semantics = [#tpu.dimension_semantics<parallel>], iteration_bounds = array<i64: 1>, scalar_prefetch = 0 : i64, scratch_operands = 0 : i64, tpu.core_type = #tpu.core_type<tc>, window_params = [{transform_indices = @transform_0, window_bounds = array<i64: 16, 32>}, {transform_indices = @transform_1, window_bounds = array<i64: 16, 1>}, {transform_indices = @transform_2, window_bounds = array<i64: 1, 1, 128>}]} {
    %c0 = arith.constant 0 : index
    %c0_0 = arith.constant 0 : index
    %0 = vector.load %arg1[%c0, %c0_0] : memref<16x32xf32, #tpu.memory_space<vmem>>, vector<16x32xf32>
    %cst = arith.constant dense<0xFF800000> : vector<16xf32>
    %1 = vector.multi_reduction <maximumf>, %0, %cst [1] : vector<16x32xf32> to vector<16xf32>
    %2 = vector.shape_cast %1 : vector<16xf32> to vector<16x1xf32>
    %3 = vector.broadcast %2 : vector<16x1xf32> to vector<16x32xf32>
    %4 = arith.subf %0, %3 : vector<16x32xf32>
    %5 = math.exp %4 : vector<16x32xf32>
    %cst_1 = arith.constant dense<0.000000e+00> : vector<16xf32>
    %6 = vector.multi_reduction <add>, %5, %cst_1 [1] : vector<16x32xf32> to vector<16xf32>
    %7 = vector.shape_cast %6 : vector<16xf32> to vector<16x1xf32>
    %8 = math.log %7 : vector<16x1xf32>
    %cst_2 = arith.constant dense<0.000000e+00> : vector<16xf32>
    %9 = vector.multi_reduction <add>, %4, %cst_2 [1] : vector<16x32xf32> to vector<16xf32>
    %10 = vector.shape_cast %9 : vector<16xf32> to vector<16x1xf32>
    %cst_3 = arith.constant 3.125000e-02 : f32
    %11 = vector.broadcast %cst_3 : f32 to vector<16x1xf32>
    %12 = arith.mulf %10, %11 : vector<16x1xf32>
    %13 = arith.subf %8, %12 : vector<16x1xf32>
    %c0_4 = arith.constant 0 : index
    %c0_5 = arith.constant 0 : index
    %14 = vector.load %arg2[%c0_4, %c0_5] : memref<16x1xi32, #tpu.memory_space<vmem>>, vector<16x1xi32>
    %15 = tpu.iota {dimensions = array<i32: 1>} : vector<16x32xi32>
    %16 = vector.broadcast %14 : vector<16x1xi32> to vector<16x32xi32>
    %17 = arith.cmpi eq, %15, %16 : vector<16x32xi32>
    %cst_6 = arith.constant 0.000000e+00 : f32
    %18 = vector.broadcast %cst_6 : f32 to vector<16x32xf32>
    %19 = arith.select %17, %4, %18 : vector<16x32xi1>, vector<16x32xf32>
    %cst_7 = arith.constant dense<0.000000e+00> : vector<16xf32>
    %20 = vector.multi_reduction <add>, %19, %cst_7 [1] : vector<16x32xf32> to vector<16xf32>
    %21 = vector.shape_cast %20 : vector<16xf32> to vector<16x1xf32>
    %22 = arith.subf %8, %21 : vector<16x1xf32>
    %cst_8 = arith.constant 0.899999976 : f32
    %23 = vector.broadcast %cst_8 : f32 to vector<16x1xf32>
    %24 = arith.mulf %23, %22 : vector<16x1xf32>
    %cst_9 = arith.constant 1.000000e-01 : f32
    %25 = vector.broadcast %cst_9 : f32 to vector<16x1xf32>
    %26 = arith.mulf %25, %13 : vector<16x1xf32>
    %27 = arith.addf %24, %26 : vector<16x1xf32>
    %28 = tpu.iota {dimensions = array<i32: 0>} : vector<16x1xi32>
    %c16_i32 = arith.constant 16 : i32
    %29 = arith.muli %arg0, %c16_i32 : i32
    %30 = vector.broadcast %29 : i32 to vector<16x1xi32>
    %31 = arith.addi %28, %30 : vector<16x1xi32>
    %c16_i32_10 = arith.constant 16 : i32
    %32 = vector.broadcast %c16_i32_10 : i32 to vector<16x1xi32>
    %33 = arith.cmpi slt, %31, %32 : vector<16x1xi32>
    %cst_11 = arith.constant 0.000000e+00 : f32
    %34 = vector.broadcast %cst_11 : f32 to vector<16x1xf32>
    %35 = arith.select %33, %27, %34 : vector<16x1xi1>, vector<16x1xf32>
    %36 = vector.shape_cast %35 : vector<16x1xf32> to vector<1x16x1xf32>
    %cst_12 = arith.constant dense<0.000000e+00> : vector<1xf32>
    %37 = vector.multi_reduction <add>, %36, %cst_12 [1, 2] : vector<1x16x1xf32> to vector<1xf32>
    %38 = vector.shape_cast %37 : vector<1xf32> to vector<1x1x1xf32>
    %39 = vector.extract %38[0, 0, 0] : f32 from vector<1x1x1xf32>
    %40 = vector.broadcast %39 : f32 to vector<1x1x128xf32>
    %c0_13 = arith.constant 0 : index
    %c0_14 = arith.constant 0 : index
    %c0_15 = arith.constant 0 : index
    %41 = vector.load %arg3[%c0_13, %c0_14, %c0_15] : memref<1x1x128xf32, #tpu.memory_space<vmem>>, vector<1x1x128xf32>
    tpu.vector_store %arg3[%c0_13, %c0_14, %c0_15], %40 {strides = array<i32>} : memref<1x1x128xf32, #tpu.memory_space<vmem>>, vector<1x1x128xf32>,
    return
  }
  func.func @transform_0(%arg0: i32) -> (i32, i32) {
    %c0_i32 = arith.constant 0 : i32
    %c0_i32_0 = arith.constant 0 : i32
    return %arg0, %c0_i32 : i32, i32
  }
  func.func @transform_1(%arg0: i32) -> (i32, i32) {
    %c0_i32 = arith.constant 0 : i32
    %c0_i32_0 = arith.constant 0 : i32
    return %arg0, %c0_i32 : i32, i32
  }
  func.func @transform_2(%arg0: i32) -> (i32, i32, i32) {
    %c0_i32 = arith.constant 0 : i32
    %c0_i32_0 = arith.constant 0 : i32
    %c0_i32_1 = arith.constant 0 : i32
    return %arg0, %c0_i32, %c0_i32_0 : i32, i32, i32
  }
}

</mosaic_0001>

<bundles_post_ra>
// kernel: tpu_custom_call.1
= control target key start
LH: loop header
LB: loop body
LE: loop exit
PB: predicated region body
PF: predicated region fallthrough
CT: control target
= control target key end

     0   :  { %vm14_vm0 = vcmask 261120   ;;  %v151_v4 = vmov 0   ;;  %s191_s0 = inlined_call_operand.vmem [shape: f32[16,32], index: 0, kind: input, shape index: {}]   ;;  %s192_s1 = inlined_call_operand.vmem [shape: s32[16,1], index: 1, kind: input, shape index: {}]   ;;  %s193_s2 = inlined_call_operand.hbm [shape: f32[1,1,128], index: 2, kind: output, shape index: {}]  }
   0x1   :  { %v12_v0 = vld [vmem:[%s191_s0] sm:$0xff]  ;;  %v13_v1 = vld [vmem:[%s191_s0 + $0x8] sm:$0xff]  ;;  %119 = vset.pattern.permute.xlu1 %v151_v4  ;;  %120 = vset.pattern.permute.xlu0 %v151_v4 }
   0x2   :  { %v47_v2 = vld [vmem:[%s192_s1] sm:$0xff]  ;;  %v15_v3 = vsel %vm14_vm0, %v12_v0, -inf }
   0x3   :  { %7 = vsyncpa [#allocation3], 0  ;;  %16 = vmax.xlane.f32.xlu0 %v15_v3  ;;  %52 = vperm.xlu1 %119, %v47_v2   ;;  %v18_v5 = vsel %vm14_vm0, %v13_v1, -inf  ;;  %v48_v6 = vld [vmem:[%s192_s1 + $0x8] sm:$0xff]  ;;  %v49_v13 = vlaneseq  ;;  %vm86_vm3 = vcmask 7168   ;;  %s152_s0 = smov [#allocation2]  }
   0x4   :  { %s107_s1 = sshll.u32 %s152_s0, 4  ;;  %s108_s1 = int_to_ptr.vmem [resolvable:$true] %s107_s1 }
   0x5   :  { %v50_v17 = vand.u32 127, %v49_v13  ;;  %s129_s18 = scalar_lea.vmem %s108_s1, 16  ;;  %s133_s19 = scalar_lea.vmem %s108_s1, 32 }
   0x6   :  { %p130_p0 = scmp.ne.s32.totalorder %s108_s1, %s129_s18  ;;  %p134_p1 = scmp.lt.s32.totalorder %s108_s1, %s108_s1 }
   0x7   :  { %19 = vmax.xlane.f32.xlu0 %v18_v5  ;;  %55 = vperm.xlu1 %119, %v48_v6   ;;  %p135_p2 = scmp.lt.s32.totalorder %s133_s19, %s129_s18 }
   0x9   :  { %p136_p3 = por %p135_p2, %p134_p1 }
   0xb   :  { %p137_p4 = pnand %p136_p3, %p130_p0 }
  0x7e   :  { %v53_v16 = vpop.permute.xlu1 %52 }
  0x7f   :  { %vm57_vm1 = vcmp.eq.s32.totalorder %v50_v17, %v53_v16 }
  0x82   :  { %v56_v21 = vpop.permute.xlu1 %55 }
  0x83   :  { %vm58_vm2 = vcmp.eq.s32.totalorder %v50_v17, %v56_v21 }
  0x8c   :  { %v17_v7 = vpop.xlane.xlu0 %16 }
  0x8d   :  { %v21_v8 = vsub.f32 %v12_v0, %v17_v7 }
  0x8f   :  { %v23_v9 = vmul.f32 1.442695, %v21_v8  ;;  %v37_v19 = vsel %vm14_vm0, %v21_v8, 0.0  ;;  %v59_v23 = vsel %vm57_vm1, %v21_v8, 0.0 }
  0x90   :  { %v20_v10 = vpop.xlane.xlu0 %19  ;;  %v61_v24 = vsel %vm14_vm0, %v59_v23, 0.0 }
  0x91   :  { %121 = vpow2.f32 %v23_v9  ;;  %v22_v11 = vsub.f32 %v13_v1, %v20_v10 }
  0x93   :  { %v25_v12 = vmul.f32 1.442695, %v22_v11  ;;  %v40_v22 = vsel %vm14_vm0, %v22_v11, 0.0  ;;  %v60_v25 = vsel %vm58_vm2, %v22_v11, 0.0 }
  0x94   :  { %v64_v26 = vsel %vm14_vm0, %v60_v25, 0.0 }
  0x95   :  { %123 = vpow2.f32 %v25_v12 }
  0x9e   :  { %v122_v14 = vpop.eup %121 }
  0x9f   :  { %v27_v15 = vsel %vm14_vm0, %v122_v14, 0.0 }
  0xa0   :  { %28 = vadd.xlane.f32.xlu0 %v27_v15 }
  0xa2   :  { %v124_v18 = vpop.eup %123 }
  0xa3   :  { %v30_v20 = vsel %vm14_vm0, %v124_v18, 0.0 }
  0xa4   :  { %38 = vadd.xlane.f32.xlu0 %v37_v19  ;;  %31 = vadd.xlane.f32.xlu1 %v30_v20 }
  0xa8   :  { %41 = vadd.xlane.f32.xlu0 %v40_v22 }
  0xac   :  { %62 = vadd.xlane.f32.xlu0 %v61_v24 }
  0xb0   :  { %65 = vadd.xlane.f32.xlu0 %v64_v26 }
 0x129   :  { %v29_v27 = vpop.xlane.xlu0 %28 }
 0x12a   :  { %125 = vlog2.f32 %v29_v27 }
 0x12d   :  { %v32_v28 = vpop.xlane.xlu1 %31  ;;  %v39_v29 = vpop.xlane.xlu0 %38 }
 0x12e   :  { %127 = vlog2.f32 %v32_v28  ;;  %v43_v34 = vmul.f32 0.03125, %v39_v29 }
 0x131   :  { %v42_v30 = vpop.xlane.xlu0 %41 }
 0x132   :  { %v44_v38 = vmul.f32 0.03125, %v42_v30 }
 0x135   :  { %v63_v32 = vpop.xlane.xlu0 %62 }
 0x137   :  { %v126_v31 = vpop.eup %125 }
 0x138   :  { %v34_v33 = vmul.f32 0.6931472, %v126_v31 }
 0x139   :  { %v66_v42 = vpop.xlane.xlu0 %65 }
 0x13a   :  { %v45_v35 = vsub.f32 %v34_v33, %v43_v34  ;;  %v67_v36 = vsub.f32 %v34_v33, %v63_v32 }
 0x13b   :  { %v128_v37 = vpop.eup %127 }
 0x13c   :  { %v36_v39 = vmul.f32 0.6931472, %v128_v37  ;;  %v71_v40 = vmul.f32 0.1, %v45_v35  ;;  %v69_v41 = vmul.f32 0.9, %v67_v36 }
 0x13e   :  { %v46_v43 = vsub.f32 %v36_v39, %v44_v38  ;;  %v68_v44 = vsub.f32 %v36_v39, %v66_v42  ;;  %v73_v46 = vadd.f32 %v71_v40, %v69_v41 }
 0x140   :  { %v72_v45 = vmul.f32 0.1, %v46_v43  ;;  %v70_v47 = vmul.f32 0.9, %v68_v44  ;;  %v87_v49 = vsel %vm86_vm3, %v73_v46, 0.0 }
 0x142   :  { %v74_v48 = vadd.f32 %v72_v45, %v70_v47 }
 0x144   :  { %v88_v50 = vsel %vm86_vm3, %v74_v48, 0.0 }
 0x145   :  { %v89_v51 = vadd.f32 %v88_v50, %v87_v49 }
 0x147   :  { %90 = vadd.xlane.f32.xlu0 %v89_v51 }
 0x1d0   :  { %v91_v52 = vpop.xlane.xlu0 %90 }
 0x1d1   :  { %v92_v53 = vrot.slane %v91_v52, 4 }
 0x1d3   :  { %v93_v54 = vadd.f32 %v92_v53, %v91_v52 }
 0x1d5   :  { %v94_v55 = vrot.slane %v93_v54, 2 }
 0x1d7   :  { %v95_v56 = vadd.f32 %v94_v55, %v93_v54 }
 0x1d9   :  { %v96_v57 = vrot.slane %v95_v56, 1 }
 0x1db   :  { %v97_v58 = vadd.f32 %v96_v57, %v95_v56 }
 0x1dd   :  { %115 = vpush %v97_v58 }
 0x20e   :  { %s116_s17 = spop %115 }
 0x20f   :  { %v99_v59 = vstv %s116_s17 }
 0x210   :  { %100 = vst [vmem:[#allocation2] sm:$0x1] %v99_v59 }
 0x211   :  { %140 = shalt.err (!%p137_p4)
}
 0x212   :  { %110 = dma.vmem_to_hbm [thread:$0]  %s108_s1, 16, %s193_s2, [#allocation3]  }
 0x213   :  { %149 = dma.done.wait [#allocation3], 16  }
 0x214   :  { %150 = vsyncadd [#allocation3], 4294967280 }
 0x215   :  { %114 = vsyncpa [#allocation3], 1 }

</bundles_post_ra>
